<compile_context>
chip_gen: v6e
topology: v6e:2x2x1
jax: 0.10.0
libtpu: 0.0.40
codegen_flags: <defaults>
</compile_context>

<pallas_src>
import functools

import jax
import jax.numpy as jnp
from jax.experimental import pallas as pl
from jax.experimental.pallas import tpu as pltpu


# ----------------------------------------------------------------------------
# Kernel: shared backbone over (anc, pos, neg) + fused pairwise distances
# ----------------------------------------------------------------------------
def triplet_kernel(x_ref, w1_ref, b1_ref, w2_ref, b2_ref,
                   emb_ref, dist_ref, acc_ref, *, inv_hw):
    """Grid = (B, n_pixel_blocks).

    x_ref   : (3, PT, Cin)  bf16   pixel tile of (anc, pos, neg) for batch row b
    w1_ref  : (Cin, Cmid)   bf16   1x1 conv weights
    b1_ref  : (1, Cmid)     f32
    w2_ref  : (Cmid, E)     f32    final FC ("resnet50.fc")
    b2_ref  : (1, E)        f32
    emb_ref : (3, E)        f32    embeddings for (anc, pos, neg), batch row b
    dist_ref: (2, 128)      f32    row0 = d(anc,pos), row1 = d(anc,neg) (lane bcast)
    acc_ref : (3, Cmid)     f32    pooled-sum accumulator (VMEM scratch)
    """
    k = pl.program_id(1)

    @pl.when(k == 0)
    def _init():
        acc_ref[...] = jnp.zeros_like(acc_ref)

    # 1x1 conv == per-pixel channel mixing -> bf16 MXU matmul, f32 accumulate.
    b1 = b1_ref[...]
    partials = []
    for img in range(3):                       # static unroll over anc/pos/neg
        h = jnp.dot(x_ref[img], w1_ref[...],
                    preferred_element_type=jnp.float32)       # (PT, Cmid) f32
        h = jnp.maximum(h + b1, 0.0)                           # bias + ReLU
        partials.append(jnp.sum(h, axis=0, keepdims=True))     # (1, Cmid)
    acc_ref[...] += jnp.concatenate(partials, axis=0)          # (3, Cmid)

    @pl.when(k == pl.num_programs(1) - 1)
    def _finalize():
        # global average pool (sum * 1/HW), then the final FC.
        pooled = acc_ref[...] * inv_hw                         # (3, Cmid)
        emb = jnp.dot(pooled, w2_ref[...],
                      preferred_element_type=jnp.float32) + b2_ref[...]  # (3, E)
        emb_ref[...] = emb.astype(emb_ref.dtype)

        # F.pairwise_distance semantics: ||a - b + eps||_2, eps = 1e-6.
        diff = emb[0:1, :] - emb[1:3, :] + jnp.float32(1e-6)   # (2, E)
        d = jnp.sqrt(jnp.sum(diff * diff, axis=-1, keepdims=True))  # (2, 1)
        dist_ref[...] = jnp.broadcast_to(d, dist_ref.shape)


# ----------------------------------------------------------------------------
# Wrapper
# ----------------------------------------------------------------------------
def triplet_forward(imgs, w1, b1, w2, b2, *, pixel_tile=128):
    """TripletNet.forward.

    imgs: (3, B, H, W, C) NHWC, pre-stacked (anchor, positive, negative).
    Returns (dist_anc2pos, dist_anc2neg, (emb_anc, emb_pos, emb_neg)).
    """
    three, B, H, W, C = imgs.shape
    assert three == 3
    HW = H * W
    pixel_tile = min(pixel_tile, HW)
    assert HW % pixel_tile == 0, "proxy shapes use an exact pixel tiling"
    CMID = w1.shape[1]
    E = w2.shape[1]

    x = imgs.reshape(3, B, HW, C)            # contiguous collapse (no copy)

    kernel = functools.partial(triplet_kernel, inv_hw=float(1.0 / HW))

    emb, dist = pl.pallas_call(
        kernel,
        grid=(B, HW // pixel_tile),
        in_specs=[
            # x: one pixel tile of all 3 images for batch row b.
            # (On v5e, add pipeline_mode=pl.Buffered(3) here if DMA is exposed.)
            pl.BlockSpec((3, None, pixel_tile, C), lambda b, k: (0, b, k, 0)),
            pl.BlockSpec((C, CMID), lambda b, k: (0, 0)),
            pl.BlockSpec((1, CMID), lambda b, k: (0, 0)),
            pl.BlockSpec((CMID, E), lambda b, k: (0, 0)),
            pl.BlockSpec((1, E), lambda b, k: (0, 0)),
        ],
        out_specs=[
            pl.BlockSpec((None, 3, E), lambda b, k: (b, 0, 0)),
            pl.BlockSpec((None, 2, 128), lambda b, k: (b, 0, 0)),
        ],
        out_shape=[
            jax.ShapeDtypeStruct((B, 3, E), jnp.float32),
            jax.ShapeDtypeStruct((B, 2, 128), jnp.float32),
        ],
        scratch_shapes=[pltpu.VMEM((3, CMID), jnp.float32)],
        compiler_params=pltpu.CompilerParams(
            # batch row axis parallel (v7x megacore), pixel reduction last.
            dimension_semantics=("parallel", "arbitrary"),
            # explicit VMEM budget; safe on all gens incl. v7x's 64 MiB/TC.
            vmem_limit_bytes=32 * 1024 * 1024,
        ),
    )(x, w1, b1, w2, b2)

    emb_anc = emb[:, 0, :]
    emb_pos = emb[:, 1, :]
    emb_neg = emb[:, 2, :]
    dist_anc2pos = dist[:, 0, 0]
    dist_anc2neg = dist[:, 1, 0]
    return dist_anc2pos, dist_anc2neg, (emb_anc, emb_pos, emb_neg)


# ----------------------------------------------------------------------------
# Main
# ----------------------------------------------------------------------------
if __name__ == "__main__":
    key = jax.random.PRNGKey(0)
    k_img, k_w1, k_b1, k_w2, k_b2 = jax.random.split(key, 5)

    # Small shapes standing in for (B, 3, 224, 224) ImageNet inputs.
    B, C, H, W = 2, 4, 16, 16
    CMID, E = 128, 128   # lane-dense proxies for resnet50's 2048-d / 1000-d dims

    # Triplet batch stored NHWC + stacked upstream, bf16 in HBM.
    imgs = jax.random.normal(k_img, (3, B, H, W, C), jnp.float32)
    imgs = imgs.astype(jnp.bfloat16)

    # Deterministic synthetic backbone parameters (first matmul fed in bf16).
    w1 = (jax.random.normal(k_w1, (C, CMID), jnp.float32) * 0.1).astype(jnp.bfloat16)
    b1 = jax.random.normal(k_b1, (1, CMID), jnp.float32) * 0.01
    w2 = jax.random.normal(k_w2, (CMID, E), jnp.float32) * 0.1
    b2 = jax.random.normal(k_b2, (1, E), jnp.float32) * 0.01

    fwd = jax.jit(triplet_forward)
    d_ap, d_an, (e_a, e_p, e_n) = fwd(imgs, w1, b1, w2, b2)
    jax.block_until_ready((d_ap, d_an, e_a, e_p, e_n))

    # Pure-JAX reference of the same forward pass.
    xf = imgs.astype(jnp.float32).reshape(3 * B, H * W, C)
    w1f = w1.astype(jnp.float32)
    h_ref = jnp.maximum(
        jnp.einsum("bpc,cm->bpm", xf, w1f,
                   precision=jax.lax.Precision.HIGHEST) + b1, 0.0)
    pooled_ref = jnp.mean(h_ref, axis=1)                              # (3B, CMID)
    emb_ref = (jnp.dot(pooled_ref, w2, precision=jax.lax.Precision.HIGHEST)
               + b2).reshape(3, B, E)

    def ref_pd(a, b):
        diff = a - b + 1e-6
        return jnp.sqrt(jnp.sum(diff * diff, axis=-1))

    ra, rp, rn = emb_ref[0], emb_ref[1], emb_ref[2]
    assert jnp.allclose(e_a, ra, atol=2e-3, rtol=2e-3), "anchor embedding mismatch"
    assert jnp.allclose(e_p, rp, atol=2e-3, rtol=2e-3), "positive embedding mismatch"
    assert jnp.allclose(e_n, rn, atol=2e-3, rtol=2e-3), "negative embedding mismatch"
    assert jnp.allclose(d_ap, ref_pd(ra, rp), atol=2e-3, rtol=2e-3), "dist a->p mismatch"
    assert jnp.allclose(d_an, ref_pd(ra, rn), atol=2e-3, rtol=2e-3), "dist a->n mismatch"
    assert d_ap.shape == (B,) and d_an.shape == (B,)
    assert e_a.shape == (B, E)

    print("KERNEL_OK")
</pallas_src>

<mosaic_0001>
module attributes {stable_mosaic.version = 11 : i64} {
  func.func @triplet_kernel(%arg0: i32, %arg1: i32, %arg2: memref<3x1x128x4xbf16, #tpu.memory_space<vmem>>, %arg3: memref<4x128xbf16, #tpu.memory_space<vmem>>, %arg4: memref<1x128xf32, #tpu.memory_space<vmem>>, %arg5: memref<128x128xf32, #tpu.memory_space<vmem>>, %arg6: memref<1x128xf32, #tpu.memory_space<vmem>>, %arg7: memref<1x3x128xf32, #tpu.memory_space<vmem>>, %arg8: memref<1x2x128xf32, #tpu.memory_space<vmem>>, %arg9: memref<3x128xf32, #tpu.memory_space<vmem>>) attributes {dimension_semantics = [#tpu.dimension_semantics<parallel>, #tpu.dimension_semantics<arbitrary>], iteration_bounds = array<i64: 2, 2>, scalar_prefetch = 0 : i64, scratch_operands = 1 : i64, tpu.core_type = #tpu.core_type<tc>, window_params = [{transform_indices = @transform_0, window_bounds = array<i64: 3, 1, 128, 4>}, {pipeline_mode = #tpu.pipeline_mode<synchronous>, transform_indices = @transform_1, window_bounds = array<i64: 4, 128>}, {pipeline_mode = #tpu.pipeline_mode<synchronous>, transform_indices = @transform_2, window_bounds = array<i64: 1, 128>}, {pipeline_mode = #tpu.pipeline_mode<synchronous>, transform_indices = @transform_3, window_bounds = array<i64: 128, 128>}, {pipeline_mode = #tpu.pipeline_mode<synchronous>, transform_indices = @transform_4, window_bounds = array<i64: 1, 128>}, {transform_indices = @transform_5, window_bounds = array<i64: 1, 3, 128>}, {transform_indices = @transform_6, window_bounds = array<i64: 1, 2, 128>}]} {
    %c0_i32 = arith.constant 0 : i32
    %0 = arith.cmpi eq, %arg1, %c0_i32 : i32
    %1 = arith.extui %0 : i1 to i32
    %c0_i32_0 = arith.constant 0 : i32
    %2 = arith.cmpi ne, %1, %c0_i32_0 : i32
    scf.if %2 {
      %cst_31 = arith.constant 0.000000e+00 : f32
      %41 = vector.broadcast %cst_31 : f32 to vector<3x128xf32>
      %c0_32 = arith.constant 0 : index
      %c0_33 = arith.constant 0 : index
      %42 = vector.load %arg9[%c0_32, %c0_33] : memref<3x128xf32, #tpu.memory_space<vmem>>, vector<3x128xf32>
      tpu.vector_store %arg9[%c0_32, %c0_33], %41 {strides = array<i32>} : memref<3x128xf32, #tpu.memory_space<vmem>>, vector<3x128xf32>,
    } else {
    }
    %c0 = arith.constant 0 : index
    %c0_1 = arith.constant 0 : index
    %3 = vector.load %arg4[%c0, %c0_1] : memref<1x128xf32, #tpu.memory_space<vmem>>, vector<1x128xf32>
    %c0_2 = arith.constant 0 : index
    %c0_3 = arith.constant 0 : index
    %c0_4 = arith.constant 0 : index
    %c0_5 = arith.constant 0 : index
    %4 = vector.load %arg2[%c0_2, %c0_3, %c0_4, %c0_5] : memref<3x1x128x4xbf16, #tpu.memory_space<vmem>>, vector<1x1x128x4xbf16>
    %5 = vector.shape_cast %4 : vector<1x1x128x4xbf16> to vector<128x4xbf16>
    %c0_6 = arith.constant 0 : index
    %c0_7 = arith.constant 0 : index
    %6 = vector.load %arg3[%c0_6, %c0_7] : memref<4x128xbf16, #tpu.memory_space<vmem>>, vector<4x128xbf16>
    %cst = arith.constant dense<0.000000e+00> : vector<128x128xf32>
    %7 = tpu.matmul %5, %6, %cst {dimension_numbers = #tpu.dot_dimension_numbers<[1], [0], [0], [1], [0, 0, 1, 1], [], []>} : vector<128x4xbf16>, vector<4x128xbf16>, vector<128x128xf32> -> vector<128x128xf32>
    %8 = vector.broadcast %3 : vector<1x128xf32> to vector<128x128xf32>
    %9 = arith.addf %7, %8 : vector<128x128xf32>
    %cst_8 = arith.constant 0.000000e+00 : f32
    %10 = vector.broadcast %cst_8 : f32 to vector<128x128xf32>
    %11 = arith.maximumf %9, %10 : vector<128x128xf32>
    %cst_9 = arith.constant dense<0.000000e+00> : vector<128xf32>
    %12 = vector.multi_reduction <add>, %11, %cst_9 [0] : vector<128x128xf32> to vector<128xf32>
    %13 = vector.shape_cast %12 : vector<128xf32> to vector<1x128xf32>
    %c1 = arith.constant 1 : index
    %c0_10 = arith.constant 0 : index
    %c0_11 = arith.constant 0 : index
    %c0_12 = arith.constant 0 : index
    %14 = vector.load %arg2[%c1, %c0_10, %c0_11, %c0_12] : memref<3x1x128x4xbf16, #tpu.memory_space<vmem>>, vector<1x1x128x4xbf16>
    %15 = vector.shape_cast %14 : vector<1x1x128x4xbf16> to vector<128x4xbf16>
    %c0_13 = arith.constant 0 : index
    %c0_14 = arith.constant 0 : index
    %16 = vector.load %arg3[%c0_13, %c0_14] : memref<4x128xbf16, #tpu.memory_space<vmem>>, vector<4x128xbf16>
    %cst_15 = arith.constant dense<0.000000e+00> : vector<128x128xf32>
    %17 = tpu.matmul %15, %16, %cst_15 {dimension_numbers = #tpu.dot_dimension_numbers<[1], [0], [0], [1], [0, 0, 1, 1], [], []>} : vector<128x4xbf16>, vector<4x128xbf16>, vector<128x128xf32> -> vector<128x128xf32>
    %18 = vector.broadcast %3 : vector<1x128xf32> to vector<128x128xf32>
    %19 = arith.addf %17, %18 : vector<128x128xf32>
    %cst_16 = arith.constant 0.000000e+00 : f32
    %20 = vector.broadcast %cst_16 : f32 to vector<128x128xf32>
    %21 = arith.maximumf %19, %20 : vector<128x128xf32>
    %cst_17 = arith.constant dense<0.000000e+00> : vector<128xf32>
    %22 = vector.multi_reduction <add>, %21, %cst_17 [0] : vector<128x128xf32> to vector<128xf32>
    %23 = vector.shape_cast %22 : vector<128xf32> to vector<1x128xf32>
    %c2 = arith.constant 2 : index
    %c0_18 = arith.constant 0 : index
    %c0_19 = arith.constant 0 : index
    %c0_20 = arith.constant 0 : index
    %24 = vector.load %arg2[%c2, %c0_18, %c0_19, %c0_20] : memref<3x1x128x4xbf16, #tpu.memory_space<vmem>>, vector<1x1x128x4xbf16>
    %25 = vector.shape_cast %24 : vector<1x1x128x4xbf16> to vector<128x4xbf16>
    %c0_21 = arith.constant 0 : index
    %c0_22 = arith.constant 0 : index
    %26 = vector.load %arg3[%c0_21, %c0_22] : memref<4x128xbf16, #tpu.memory_space<vmem>>, vector<4x128xbf16>
    %cst_23 = arith.constant dense<0.000000e+00> : vector<128x128xf32>
    %27 = tpu.matmul %25, %26, %cst_23 {dimension_numbers = #tpu.dot_dimension_numbers<[1], [0], [0], [1], [0, 0, 1, 1], [], []>} : vector<128x4xbf16>, vector<4x128xbf16>, vector<128x128xf32> -> vector<128x128xf32>
    %28 = vector.broadcast %3 : vector<1x128xf32> to vector<128x128xf32>
    %29 = arith.addf %27, %28 : vector<128x128xf32>
    %cst_24 = arith.constant 0.000000e+00 : f32
    %30 = vector.broadcast %cst_24 : f32 to vector<128x128xf32>
    %31 = arith.maximumf %29, %30 : vector<128x128xf32>
    %cst_25 = arith.constant dense<0.000000e+00> : vector<128xf32>
    %32 = vector.multi_reduction <add>, %31, %cst_25 [0] : vector<128x128xf32> to vector<128xf32>
    %33 = vector.shape_cast %32 : vector<128xf32> to vector<1x128xf32>
    %c0_26 = arith.constant 0 : index
    %c0_27 = arith.constant 0 : index
    %34 = vector.load %arg9[%c0_26, %c0_27] : memref<3x128xf32, #tpu.memory_space<vmem>>, vector<3x128xf32>
    %35 = tpu.concatenate %13, %23, %33 in 0 : vector<1x128xf32>, vector<1x128xf32>, vector<1x128xf32> -> vector<3x128xf32>
    %36 = arith.addf %34, %35 : vector<3x128xf32>
    %c0_28 = arith.constant 0 : index
    %c0_29 = arith.constant 0 : index
    %37 = vector.load %arg9[%c0_28, %c0_29] : memref<3x128xf32, #tpu.memory_space<vmem>>, vector<3x128xf32>
    tpu.vector_store %arg9[%c0_28, %c0_29], %36 {strides = array<i32>} : memref<3x128xf32, #tpu.memory_space<vmem>>, vector<3x128xf32>,
    %c1_i32 = arith.constant 1 : i32
    %38 = arith.cmpi eq, %arg1, %c1_i32 : i32
    %39 = arith.extui %38 : i1 to i32
    %c0_i32_30 = arith.constant 0 : i32
    %40 = arith.cmpi ne, %39, %c0_i32_30 : i32
    scf.if %40 {
      %c0_31 = arith.constant 0 : index
      %c0_32 = arith.constant 0 : index
      %41 = vector.load %arg9[%c0_31, %c0_32] : memref<3x128xf32, #tpu.memory_space<vmem>>, vector<3x128xf32>
      %cst_33 = arith.constant 3.906250e-03 : f32
      %42 = vector.broadcast %cst_33 : f32 to vector<3x128xf32>
      %43 = arith.mulf %41, %42 : vector<3x128xf32>
      %c0_34 = arith.constant 0 : index
      %c0_35 = arith.constant 0 : index
      %44 = vector.load %arg5[%c0_34, %c0_35] : memref<128x128xf32, #tpu.memory_space<vmem>>, vector<128x128xf32>
      %cst_36 = arith.constant dense<0.000000e+00> : vector<3x128xf32>
      %45 = tpu.matmul %43, %44, %cst_36 {dimension_numbers = #tpu.dot_dimension_numbers<[1], [0], [0], [1], [0, 0, 1, 1], [], []>} : vector<3x128xf32>, vector<128x128xf32>, vector<3x128xf32> -> vector<3x128xf32>
      %c0_37 = arith.constant 0 : index
      %c0_38 = arith.constant 0 : index
      %46 = vector.load %arg6[%c0_37, %c0_38] : memref<1x128xf32, #tpu.memory_space<vmem>>, vector<1x128xf32>
      %47 = vector.broadcast %46 : vector<1x128xf32> to vector<3x128xf32>
      %48 = arith.addf %45, %47 : vector<3x128xf32>
      %c0_39 = arith.constant 0 : index
      %c0_40 = arith.constant 0 : index
      %c0_41 = arith.constant 0 : index
      %49 = vector.load %arg7[%c0_39, %c0_40, %c0_41] : memref<1x3x128xf32, #tpu.memory_space<vmem>>, vector<1x3x128xf32>
      %50 = vector.shape_cast %49 : vector<1x3x128xf32> to vector<3x128xf32>
      %51 = vector.shape_cast %48 : vector<3x128xf32> to vector<1x3x128xf32>
      tpu.vector_store %arg7[%c0_39, %c0_40, %c0_41], %51 {strides = array<i32>} : memref<1x3x128xf32, #tpu.memory_space<vmem>>, vector<1x3x128xf32>,
      %52 = vector.extract_strided_slice %48 {offsets = [0, 0], sizes = [1, 128], strides = [1, 1]} : vector<3x128xf32> to vector<1x128xf32>
      %53 = vector.extract_strided_slice %48 {offsets = [1, 0], sizes = [2, 128], strides = [1, 1]} : vector<3x128xf32> to vector<2x128xf32>
      %54 = vector.broadcast %52 : vector<1x128xf32> to vector<2x128xf32>
      %55 = arith.subf %54, %53 : vector<2x128xf32>
      %cst_42 = arith.constant 9.99999997E-7 : f32
      %56 = vector.broadcast %cst_42 : f32 to vector<2x128xf32>
      %57 = arith.addf %55, %56 : vector<2x128xf32>
      %58 = arith.mulf %57, %57 : vector<2x128xf32>
      %cst_43 = arith.constant dense<0.000000e+00> : vector<2xf32>
      %59 = vector.multi_reduction <add>, %58, %cst_43 [1] : vector<2x128xf32> to vector<2xf32>
      %60 = vector.shape_cast %59 : vector<2xf32> to vector<2x1xf32>
      %61 = math.sqrt %60 : vector<2x1xf32>
      %62 = vector.shape_cast %61 : vector<2x1xf32> to vector<2x1xf32>
      %63 = vector.broadcast %62 : vector<2x1xf32> to vector<2x128xf32>
      %c0_44 = arith.constant 0 : index
      %c0_45 = arith.constant 0 : index
      %c0_46 = arith.constant 0 : index
      %64 = vector.load %arg8[%c0_44, %c0_45, %c0_46] : memref<1x2x128xf32, #tpu.memory_space<vmem>>, vector<1x2x128xf32>
      %65 = vector.shape_cast %64 : vector<1x2x128xf32> to vector<2x128xf32>
      %66 = vector.shape_cast %63 : vector<2x128xf32> to vector<1x2x128xf32>
      tpu.vector_store %arg8[%c0_44, %c0_45, %c0_46], %66 {strides = array<i32>} : memref<1x2x128xf32, #tpu.memory_space<vmem>>, vector<1x2x128xf32>,
    } else {
    }
    return
  }
  func.func @transform_0(%arg0: i32, %arg1: i32) -> (i32, i32, i32, i32) {
    %c0_i32 = arith.constant 0 : i32
    %c0_i32_0 = arith.constant 0 : i32
    %c0_i32_1 = arith.constant 0 : i32
    return %c0_i32, %arg0, %arg1, %c0_i32_0 : i32, i32, i32, i32
  }
  func.func @transform_1(%arg0: i32, %arg1: i32) -> (i32, i32) {
    %c0_i32 = arith.constant 0 : i32
    %c0_i32_0 = arith.constant 0 : i32
    %c0_i32_1 = arith.constant 0 : i32
    return %c0_i32, %c0_i32_0 : i32, i32
  }
  func.func @transform_2(%arg0: i32, %arg1: i32) -> (i32, i32) {
    %c0_i32 = arith.constant 0 : i32
    %c0_i32_0 = arith.constant 0 : i32
    %c0_i32_1 = arith.constant 0 : i32
    return %c0_i32, %c0_i32_0 : i32, i32
  }
  func.func @transform_3(%arg0: i32, %arg1: i32) -> (i32, i32) {
    %c0_i32 = arith.constant 0 : i32
    %c0_i32_0 = arith.constant 0 : i32
    %c0_i32_1 = arith.constant 0 : i32
    return %c0_i32, %c0_i32_0 : i32, i32
  }
  func.func @transform_4(%arg0: i32, %arg1: i32) -> (i32, i32) {
    %c0_i32 = arith.constant 0 : i32
    %c0_i32_0 = arith.constant 0 : i32
    %c0_i32_1 = arith.constant 0 : i32
    return %c0_i32, %c0_i32_0 : i32, i32
  }
  func.func @transform_5(%arg0: i32, %arg1: i32) -> (i32, i32, i32) {
    %c0_i32 = arith.constant 0 : i32
    %c0_i32_0 = arith.constant 0 : i32
    %c0_i32_1 = arith.constant 0 : i32
    return %arg0, %c0_i32, %c0_i32_0 : i32, i32, i32
  }
  func.func @transform_6(%arg0: i32, %arg1: i32) -> (i32, i32, i32) {
    %c0_i32 = arith.constant 0 : i32
    %c0_i32_0 = arith.constant 0 : i32
    %c0_i32_1 = arith.constant 0 : i32
    return %arg0, %c0_i32, %c0_i32_0 : i32, i32, i32
  }
}

</mosaic_0001>

<bundles_post_ra>
// kernel: triplet_forward.1
= control target key start
LH: loop header
LB: loop body
LE: loop exit
PB: predicated region body
PF: predicated region fallthrough
CT: control target
= control target key end

     0   :  { %s1818_s21 = smov 0   ;;  %s1820_s22 = smov 0   ;;  %s2139_s0 = inlined_call_operand.vmem [shape: bf16[3,2,256,4], index: 0, kind: input, shape index: {}]   ;;  %s2140_s1 = inlined_call_operand.vmem [shape: bf16[4,128], index: 1, kind: input, shape index: {}]   ;;  %s2141_s2 = inlined_call_operand.vmem [shape: f32[1,128], index: 2, kind: input, shape index: {}]   ;;  %s2142_s3 = inlined_call_operand.vmem [shape: f32[128,128], index: 3, kind: input, shape index: {}]   ;;  %s2143_s4 = inlined_call_operand.vmem [shape: f32[1,128], index: 4, kind: input, shape index: {}]   ;;  %s2144_s5 = inlined_call_operand.vmem [shape: f32[2,3,128], index: 5, kind: output, shape index: {0}]   ;;  %s2145_s6 = inlined_call_operand.vmem [shape: f32[2,2,128], index: 6, kind: output, shape index: {1}]  }
   0x1   :  { %s1822_s23 = smov 0   ;;  %s1824_s24 = smov 0  }
   0x2   :  { %s1826_s25 = smov 0   ;;  %s1828_s26 = smov 0  }
   0x3   :  { %s1830_s27 = smov 0  }
   0x4 LB: > { %s26_s28 = sadd.s32 1, %s1770_s25  ;;  %s29_s29 = sadd.s32 1, %s1774_s26  ;;  %s1778_s27 = sphi %s1830_s27, %s17_s27   ;;  %s1774_s26 = sphi %s1828_s26, %s2151_s26   ;;  %s1770_s25 = sphi %s1826_s25, %s2150_s25   ;;  %s1766_s24 = sphi %s1824_s24, %s2149_s24   ;;  %s1762_s23 = sphi %s1822_s23, %s2148_s23   ;;  %s1758_s22 = sphi %s1820_s22, %s2147_s22   ;;  %s1754_s21 = sphi %s1818_s21, %s2146_s21  }
   0x5   : > { %p27_p0 = scmp.ge.s32.totalorder %s26_s28, 2  ;;  %p45_p1 = scmp.ne.s32.totalorder %s1758_s22, %s1754_s21 }
   0x6   : > { %p46_p2 = scmp.eq.s32.totalorder %s1778_s27, 0  ;;  %s38_s9 = sadd.s32 1, %s1758_s22 }
   0x7   : > { %s2153_s28 = smov (%p27_p0, %s26_s28), 0  ;;  %s2155_s29 = smov (!%p27_p0, %s29_s29), %s1774_s26 }
   0x8   : > { %p47_p3 = por %p46_p2, %p45_p1  ;;  %p31_p4 = scmp.ge.s32.totalorder %s2155_s29, 2 }
   0x9   : > { %s34_s30 = ssub.s32 %s1770_s25, %s2153_s28  ;;  %p1405_p6 = scmp.ge.s32.totalorder %s1778_s27, 4 }
   0xa   : > { %s2157_s29 = smov (%p31_p4, %s2155_s29), 0 }
   0xb   : > { %s33_s7 = ssub.s32 %s1774_s26, %s2157_s29  ;;  %219 = sbr.rel (%p1405_p6) target bundleno = 35 (0x23), region = 32 }
   0xc   : > { %s35_s8 = sor.u32 %s34_s30, %s33_s7 }
   0xd   : > { %p36_p5 = scmp.eq.s32.totalorder %s35_s8, 0 }
   0xf   : > { %s1869_s10 = scalar_select %p36_p5, %s1758_s22, %s38_s9  }
  0x10   : > { %222 = sbr.rel (!%p47_p3) target bundleno = 35 (0x23), region = 36  ;;  %s224_s11 = sand.u32 (%p47_p3), 1, %s1758_s22  }
  0x11   : > { %s1406_s12 = sshll.u32 (%p47_p3), %s1770_s25, 4  ;;  %s1637_s13 = smul.u32 (%p47_p3), 192, %s224_s11 }
  0x12   : > { %s1407_s14 = sshll.u32 (%p47_p3), %s1774_s26, 5 }
  0x13   : > { %s229_s15 = sadd.s32 (%p47_p3), %s1407_s14, %s1406_s12  ;;  %s1883_s20 = scalar_lea.vmem (%p47_p3), [#allocation3], %s1637_s13 }
  0x14   : > { %s1408_s16 = sshll.u32 (%p47_p3), %s229_s15, 2 }
  0x15   : > { %s1878_s19 = scalar_lea.vmem %s2139_s0, %s1408_s16 }
  0x16   : > { %v248_v0 = vld [vmem:[%s1878_s19] sm:$0xff]   ;;  %v252_v1 = vld [vmem:[%s1878_s19 + $0x8] sm:$0xff]   ;;  %v256_v2 = vld [vmem:[%s1878_s19 + $0x10] sm:$0xff]  }
  0x17   : > { %249 = vst [vmem:[%s1883_s20] sm:$0xff] %v248_v0   ;;  %253 = vst [vmem:[%s1883_s20 + $0x8] sm:$0xff] %v252_v1   ;;  %v260_v3 = vld [vmem:[%s1878_s19 + $0x18] sm:$0xff]   ;;  %v264_v4 = vld [vmem:[%s1878_s19 + $0x20] sm:$0xff]  }
  0x18   : > { %257 = vst [vmem:[%s1883_s20 + $0x10] sm:$0xff] %v256_v2   ;;  %v268_v5 = vld [vmem:[%s1878_s19 + $0x28] sm:$0xff]   ;;  %261 = vst [vmem:[%s1883_s20 + $0x18] sm:$0xff] %v260_v3   ;;  %v272_v6 = vld [vmem:[%s1878_s19 + $0x30] sm:$0xff]  }
  0x19   : > { %265 = vst [vmem:[%s1883_s20 + $0x20] sm:$0xff] %v264_v4   ;;  %269 = vst [vmem:[%s1883_s20 + $0x28] sm:$0xff] %v268_v5   ;;  %v276_v7 = vld [vmem:[%s1878_s19 + $0x38] sm:$0xff]   ;;  %v280_v8 = vld [vmem:[%s1878_s19 + $0x100] sm:$0xff]  }
  0x1a   : > { %273 = vst [vmem:[%s1883_s20 + $0x30] sm:$0xff] %v272_v6   ;;  %277 = vst [vmem:[%s1883_s20 + $0x38] sm:$0xff] %v276_v7   ;;  %v284_v9 = vld [vmem:[%s1878_s19 + $0x108] sm:$0xff]   ;;  %v288_v10 = vld [vmem:[%s1878_s19 + $0x110] sm:$0xff]  }
  0x1b   : > { %281 = vst [vmem:[%s1883_s20 + $0x40] sm:$0xff] %v280_v8   ;;  %v292_v11 = vld [vmem:[%s1878_s19 + $0x118] sm:$0xff]   ;;  %285 = vst [vmem:[%s1883_s20 + $0x48] sm:$0xff] %v284_v9   ;;  %v296_v12 = vld [vmem:[%s1878_s19 + $0x120] sm:$0xff]  }
  0x1c   : > { %289 = vst [vmem:[%s1883_s20 + $0x50] sm:$0xff] %v288_v10   ;;  %293 = vst [vmem:[%s1883_s20 + $0x58] sm:$0xff] %v292_v11   ;;  %v300_v13 = vld [vmem:[%s1878_s19 + $0x128] sm:$0xff]   ;;  %v304_v14 = vld [vmem:[%s1878_s19 + $0x130] sm:$0xff]  }
  0x1d   : > { %297 = vst [vmem:[%s1883_s20 + $0x60] sm:$0xff] %v296_v12   ;;  %301 = vst [vmem:[%s1883_s20 + $0x68] sm:$0xff] %v300_v13   ;;  %v308_v15 = vld [vmem:[%s1878_s19 + $0x138] sm:$0xff]   ;;  %v312_v16 = vld [vmem:[%s1878_s19 + $0x200] sm:$0xff]  }
  0x1e   : > { %305 = vst [vmem:[%s1883_s20 + $0x70] sm:$0xff] %v304_v14   ;;  %v316_v17 = vld [vmem:[%s1878_s19 + $0x208] sm:$0xff]   ;;  %309 = vst [vmem:[%s1883_s20 + $0x78] sm:$0xff] %v308_v15   ;;  %v320_v18 = vld [vmem:[%s1878_s19 + $0x210] sm:$0xff]  }
  0x1f   : > { %313 = vst [vmem:[%s1883_s20 + $0x80] sm:$0xff] %v312_v16   ;;  %317 = vst [vmem:[%s1883_s20 + $0x88] sm:$0xff] %v316_v17   ;;  %v324_v19 = vld [vmem:[%s1878_s19 + $0x218] sm:$0xff]   ;;  %v328_v20 = vld [vmem:[%s1878_s19 + $0x220] sm:$0xff]  }
  0x20   : > { %321 = vst [vmem:[%s1883_s20 + $0x90] sm:$0xff] %v320_v18   ;;  %325 = vst [vmem:[%s1883_s20 + $0x98] sm:$0xff] %v324_v19   ;;  %v332_v21 = vld [vmem:[%s1878_s19 + $0x228] sm:$0xff]   ;;  %v336_v22 = vld [vmem:[%s1878_s19 + $0x230] sm:$0xff]  }
  0x21   : > { %329 = vst [vmem:[%s1883_s20 + $0xa0] sm:$0xff] %v328_v20   ;;  %v340_v23 = vld [vmem:[%s1878_s19 + $0x238] sm:$0xff]   ;;  %333 = vst [vmem:[%s1883_s20 + $0xa8] sm:$0xff] %v332_v21  }
  0x22   : > { %337 = vst [vmem:[%s1883_s20 + $0xb0] sm:$0xff] %v336_v22   ;;  %341 = vst [vmem:[%s1883_s20 + $0xb8] sm:$0xff] %v340_v23  }
  0x23 PF: > { %p1409_p7 = scmp.ge.s32.totalorder %s1778_s27, 1  ;;  %p462_p8 = scmp.lt.s32.totalorder %s1778_s27, 5 }
  0x25   : > { %p463_p9 = pnand %p1409_p7, %p462_p8 }
  0x26   : > { %s469_s30 = sand.u32 (!%p463_p9), 1, %s1754_s21   ;;  %p502_p10 = scmp.lt.s32.totalorder (!%p463_p9), %s1766_s24, 1 }
  0x27   : > { %466 = sbr.rel (%p463_p9) target bundleno = 717 (0x2cd), region = 77  ;;  %p1412_p11 = scmp.ne.s32.totalorder (!%p463_p9), %s1762_s23, 0 }
  0x28   : > { %s1638_s7 = smul.u32 (!%p463_p9), 192, %s469_s30 }
  0x2a   : > { %s1945_s17 = scalar_lea.vmem (!%p463_p9), [#allocation3], %s1638_s7 }
  0x2c   : > { %s2159_s24 = smov (!%p502_p10, %s1766_s24), 1  ;;  %514 = sbr.rel (%p1412_p11) target bundleno = 51 (0x33), region = 85 }
  0x2d   : > { %s1410_s8 = sshll.u32 %s2159_s24, 2  ;;  %s1411_s9 = sshll.u32 %s2159_s24, 1 }
  0x2e   : > { %s1938_s13 = scalar_lea.vmem %s2144_s5, %s1410_s8  ;;  %s1943_s16 = scalar_lea.vmem %s2145_s6, %s1411_s9 }
  0x31   : > { %v1780_v24 = vmov 0.0  }
  0x32   : > { %515 = vst [vmem:[#allocation2] sm:$0x7] %v1780_v24 }
  0x33 PF: > { %v533_v25 = vld [vmem:[%s2140_s1] sm:$0x3]  ;;  %vm605_vm0 = vcmask 1041408   ;;  %v1698_v26 = vld [vmem:[%s1945_s17] sm:$0xff]   ;;  %vm580_vm1 = vcmask 31744   ;;  %v1700_v29 = vld [vmem:[%s1945_s17 + $0x8] sm:$0xff]  }
  0x34   : > { %1633 = vmatprep.subr.msk.bf16.mxu0 %vm605_vm0, %v533_v25  ;;  %1634 = vmatprep.subr.msk.bf16.mxu1 %vm605_vm0, %v533_v25  ;;  %v607_v27 = vsel %vm605_vm0, %v533_v25, 0  ;;  %v1699_v28 = vld [vmem:[%s1945_s17 + $0x20] sm:$0xff]   ;;  %v1701_v30 = vld [vmem:[%s1945_s17 + $0x28] sm:$0xff]   ;;  %v1702_v31 = vld [vmem:[%s1945_s17 + $0x10] sm:$0xff]   ;;  %vm1174_vm2 = vcmask 1040384   ;;  %p1494_p12 = scmp.ne.s32.totalorder %s1762_s23, 1 }
  0x35   : > { %1543 = vmatpush3.bf16.msra.mxu0 %v607_v27  ;;  %1632 = vmatpush3.bf16.msra.mxu1 %v607_v27  ;;  %v1703_v32 = vld [vmem:[%s1945_s17 + $0x30] sm:$0xff]   ;;  %v1704_v33 = vld [vmem:[%s1945_s17 + $0x18] sm:$0xff]   ;;  %v1707_v35 = vld [vmem:[%s1945_s17 + $0x80] sm:$0xff]  }
  0x36   : > { %1544 = vmatprep.mubr.msk.bf16.mxu0 %vm580_vm1, %v1698_v26  ;;  %1635 = vmatprep.subr.msk.bf16.mxu1 %vm605_vm0, %v533_v25  ;;  %v1705_v34 = vld [vmem:[%s1945_s17 + $0x38] sm:$0xff]   ;;  %v1706_v36 = vld [vmem:[%s1945_s17 + $0x40] sm:$0xff]   ;;  %v1708_v37 = vld [vmem:[%s1945_s17 + $0x48] sm:$0xff]  }
  0x37   : > { %1552 = vmatprep.mubr.msk.bf16.mxu1 %vm580_vm1, %v1699_v28  ;;  %1636 = vmatprep.subr.msk.bf16.mxu0 %vm605_vm0, %v533_v25  ;;  %v1709_v38 = vld [vmem:[%s1945_s17 + $0x88] sm:$0xff]   ;;  %v1711_v39 = vld [vmem:[%s1945_s17 + $0x90] sm:$0xff]   ;;  %v1713_v41 = vld [vmem:[%s1945_s17 + $0x98] sm:$0xff]  }
  0x38   : > { %1545 = vmatmul.mubr.msk.bf16.vlgmr.msra.gmra.mxu0 %vm580_vm1, %v1700_v29  ;;  %1553 = vmatmul.mubr.msk.bf16.vlgmr.msra.gmra.mxu1 %vm580_vm1, %v1701_v30  ;;  %v1710_v40 = vld [vmem:[%s1945_s17 + $0x50] sm:$0xff]   ;;  %v1712_v42 = vld [vmem:[%s1945_s17 + $0x58] sm:$0xff]   ;;  %v1715_v43 = vld [vmem:[%s1945_s17 + $0xa0] sm:$0xff]  }
  0x39   : > { %1579 = vmatpush3.bf16.msra.mxu0 %v607_v27  ;;  %1561 = vmatpush3.bf16.msra.mxu1 %v607_v27  ;;  %v1714_v44 = vld [vmem:[%s1945_s17 + $0x60] sm:$0xff]   ;;  %v1717_v45 = vld [vmem:[%s1945_s17 + $0xa8] sm:$0xff]   ;;  %v1719_v47 = vld [vmem:[%s1945_s17 + $0xb0] sm:$0xff]  }
  0x3a   : > { %1548 = vmatprep.mubr.msk.bf16.mxu0 %vm580_vm1, %v1702_v31  ;;  %1556 = vmatprep.mubr.msk.bf16.mxu1 %vm580_vm1, %v1703_v32  ;;  %v1716_v46 = vld [vmem:[%s1945_s17 + $0x68] sm:$0xff]   ;;  %v1718_v48 = vld [vmem:[%s1945_s17 + $0x70] sm:$0xff]   ;;  %v1721_v49 = vld [vmem:[%s1945_s17 + $0xb8] sm:$0xff]  }
  0x3b   : > { %v1720_v50 = vld [vmem:[%s1945_s17 + $0x78] sm:$0xff]  }
  0x3c   : > { %v2007_v55 = vld [vmem:[%s2141_s2] ss:$0 sm:$0xff] }
  0x40   : > { %1549 = vmatmul.mubr.msk.bf16.gmra.mxu0 %vm580_vm1, %v1704_v33  ;;  %1557 = vmatmul.mubr.msk.bf16.gmra.mxu1 %vm580_vm1, %v1705_v34 }
  0x41   : > { %1580 = vmatprep.mubr.msk.bf16.mxu0 %vm580_vm1, %v1707_v35  ;;  %1562 = vmatprep.mubr.msk.bf16.mxu1 %vm580_vm1, %v1706_v36 }
  0x48   : > { %1581 = vmatmul.mubr.msk.bf16.vlgmr.msra.gmra.mxu0 %vm580_vm1, %v1709_v38  ;;  %1563 = vmatmul.mubr.msk.bf16.vlgmr.msra.gmra.mxu1 %vm580_vm1, %v1708_v37 }
  0x49   : > { %1584 = vmatprep.mubr.msk.bf16.mxu0 %vm580_vm1, %v1711_v39  ;;  %1566 = vmatprep.mubr.msk.bf16.mxu1 %vm580_vm1, %v1710_v40 }
  0x50   : > { %1585 = vmatmul.mubr.msk.bf16.gmra.mxu0 %vm580_vm1, %v1713_v41  ;;  %1567 = vmatmul.mubr.msk.bf16.gmra.mxu1 %vm580_vm1, %v1712_v42 }
  0x51   : > { %1588 = vmatprep.mubr.msk.bf16.mxu0 %vm580_vm1, %v1715_v43  ;;  %1570 = vmatprep.mubr.msk.bf16.mxu1 %vm580_vm1, %v1714_v44 }
  0x58   : > { %1589 = vmatmul.mubr.msk.bf16.gmra.mxu0 %vm580_vm1, %v1717_v45  ;;  %1571 = vmatmul.mubr.msk.bf16.gmra.mxu1 %vm580_vm1, %v1716_v46 }
  0x59   : > { %1592 = vmatprep.mubr.msk.bf16.mxu0 %vm580_vm1, %v1719_v47  ;;  %1574 = vmatprep.mubr.msk.bf16.mxu1 %vm580_vm1, %v1718_v48 }
  0x60   : > { %1593 = vmatmul.mubr.msk.bf16.gmra.mxu0 %vm580_vm1, %v1721_v49  ;;  %1575 = vmatmul.mubr.msk.bf16.gmra.mxu1 %vm580_vm1, %v1720_v50 }
  0xf8   : > { %v1546_v51 = vpop.f32.mrf.mxu0  ;;  %v1554_v52 = vpop.f32.mrf.mxu1 }
  0xf9   : > { %v652_v60 = vadd.f32 %v1546_v51, %v2007_v55  ;;  %v684_v24 = vadd.f32 %v1554_v52, %v2007_v55 }
  0xfa   : > { %v643_v53 = vpop.f32.mrf.mxu0  ;;  %v675_v54 = vpop.f32.mrf.mxu1 }
  0xfb   : > { %v644_v57 = vadd.f32 %v2007_v55, %v643_v53  ;;  %v708_v5 = vmax.f32 %v652_v60, 0.0  ;;  %v676_v25 = vadd.f32 %v2007_v55, %v675_v54  ;;  %v716_v37 = vmax.f32 %v684_v24, 0.0 }
  0xfc   : > { %v1547_v56 = vpop.f32.mrf.mxu0  ;;  %v1555_v58 = vpop.f32.mrf.mxu1 }
  0xfd   : > { %v706_v0 = vmax.f32 %v644_v57, 0.0  ;;  %v655_v1 = vadd.f32 %v1547_v56, %v2007_v55  ;;  %v687_v27 = vadd.f32 %v1555_v58, %v2007_v55  ;;  %v714_v38 = vmax.f32 %v676_v25, 0.0 }
  0xfe   : > { %v646_v59 = vpop.f32.mrf.mxu0  ;;  %v678_v62 = vpop.f32.mrf.mxu1 }
  0xff   : > { %v647_v61 = vadd.f32 %v2007_v55, %v646_v59  ;;  %v709_v10 = vmax.f32 %v655_v1, 0.0  ;;  %v679_v31 = vadd.f32 %v2007_v55, %v678_v62  ;;  %v717_v41 = vmax.f32 %v687_v27, 0.0 }
 0x100   : > { %v1550_v63 = vpop.f32.mrf.mxu0  ;;  %v2013_v3 = vpop.f32.mrf.mxu1 }
 0x101   : > { %v707_v2 = vmax.f32 %v647_v61, 0.0  ;;  %v668_v14 = vadd.f32 %v1550_v63, %v2007_v55  ;;  %v715_v46 = vmax.f32 %v679_v31, 0.0 }
 0x102   : > { %v659_v4 = vpop.f32.mrf.mxu0  ;;  %v691_v8 = vpop.f32.mrf.mxu1 }
 0x103   : > { %v722_v6 = vadd.f32 %v707_v2, %v706_v0  ;;  %v660_v7 = vadd.f32 %v2007_v55, %v659_v4  ;;  %v712_v28 = vmax.f32 %v668_v14, 0.0  ;;  %v692_v47 = vadd.f32 %v2007_v55, %v691_v8 }
 0x104   : > { %v1551_v9 = vpop.f32.mrf.mxu0  ;;  %v2016_v12 = vpop.f32.mrf.mxu1  ;;  %v700_v4 = vadd.f32 %v2013_v3, %v2007_v55 }
 0x105   : > { %v723_v11 = vadd.f32 %v722_v6, %v708_v5  ;;  %v710_v15 = vmax.f32 %v660_v7, 0.0  ;;  %v671_v21 = vadd.f32 %v1551_v9, %v2007_v55  ;;  %v718_v9 = vmax.f32 %v692_v47, 0.0 }
 0x106   : > { %v662_v13 = vpop.f32.mrf.mxu0  ;;  %v694_v18 = vpop.f32.mrf.mxu1 }
 0x107   : > { %v724_v16 = vadd.f32 %v723_v11, %v709_v10  ;;  %v663_v17 = vadd.f32 %v2007_v55, %v662_v13  ;;  %v713_v33 = vmax.f32 %v671_v21, 0.0  ;;  %v695_v57 = vadd.f32 %v2007_v55, %v694_v18 }
 0x108   : > { %v1582_v19 = vpop.f32.mrf.mxu0  ;;  %v1564_v23 = vpop.f32.mrf.mxu1 }
 0x109   : > { %v725_v20 = vadd.f32 %v724_v16, %v710_v15  ;;  %v711_v22 = vmax.f32 %v663_v17, 0.0  ;;  %v1082_v43 = vadd.f32 %v1582_v19, %v2007_v55  ;;  %v867_v48 = vadd.f32 %v1564_v23, %v2007_v55 }
 0x10a   : > { %v1073_v26 = vpop.f32.mrf.mxu0  ;;  %v858_v30 = vpop.f32.mrf.mxu1  ;;  %v719_v15 = vmax.f32 %v695_v57, 0.0 }
 0x10b   : > { %v726_v29 = vadd.f32 %v725_v20, %v711_v22  ;;  %v1074_v35 = vadd.f32 %v2007_v55, %v1073_v26  ;;  %v859_v39 = vadd.f32 %v2007_v55, %v858_v30  ;;  %v1138_v63 = vmax.f32 %v1082_v43, 0.0 }
 0x10c   : > { %v1583_v32 = vpop.f32.mrf.mxu0  ;;  %v1565_v36 = vpop.f32.mrf.mxu1  ;;  %v923_v5 = vmax.f32 %v867_v48, 0.0 }
 0x10d   : > { %v727_v34 = vadd.f32 %v726_v29, %v712_v28  ;;  %v1136_v52 = vmax.f32 %v1074_v35, 0.0  ;;  %v1085_v53 = vadd.f32 %v1583_v32, %v2007_v55  ;;  %v921_v58 = vmax.f32 %v859_v39, 0.0 }
 0x10e   : > { %v1076_v40 = vpop.f32.mrf.mxu0  ;;  %v861_v44 = vpop.f32.mrf.mxu1  ;;  %v870_v59 = vadd.f32 %v1565_v36, %v2007_v55 }
 0x10f   : > { %v728_v42 = vadd.f32 %v727_v34, %v713_v33  ;;  %v1077_v45 = vadd.f32 %v2007_v55, %v1076_v40  ;;  %v862_v49 = vadd.f32 %v2007_v55, %v861_v44  ;;  %v1139_v11 = vmax.f32 %v1085_v53, 0.0 }
 0x110   : > { %v1586_v50 = vpop.f32.mrf.mxu0  ;;  %v1568_v56 = vpop.f32.mrf.mxu1  ;;  %v924_v16 = vmax.f32 %v870_v59, 0.0  ;;  %v703_v34 = vadd.f32 %v2016_v12, %v2007_v55  ;;  %v720_v44 = vmax.f32 %v700_v4, 0.0 }
 0x111   : > { %v729_v51 = vadd.f32 %v728_v42, %v714_v38  ;;  %v1137_v54 = vmax.f32 %v1077_v45, 0.0  ;;  %v922_v60 = vmax.f32 %v862_v49, 0.0  ;;  %v1098_v18 = vadd.f32 %v1586_v50, %v2007_v55 }
 0x112   : > { %v1089_v61 = vpop.f32.mrf.mxu0  ;;  %v874_v1 = vpop.f32.mrf.mxu1  ;;  %v883_v24 = vadd.f32 %v1568_v56, %v2007_v55 }
 0x113   : > { %v730_v62 = vadd.f32 %v729_v51, %v715_v46  ;;  %v1152_v0 = vadd.f32 %v1137_v54, %v1136_v52  ;;  %v1090_v2 = vadd.f32 %v2007_v55, %v1089_v61  ;;  %v937_v6 = vadd.f32 %v922_v60, %v921_v58 }
 0x114   : > { %v875_v7 = vadd.f32 %v2007_v55, %v874_v1  ;;  %v1587_v8 = vpop.f32.mrf.mxu0  ;;  %v1569_v14 = vpop.f32.mrf.mxu1  ;;  %v1142_v40 = vmax.f32 %v1098_v18, 0.0  ;;  %v927_v45 = vmax.f32 %v883_v24, 0.0  ;;  %v721_v51 = vmax.f32 %v703_v34, 0.0 }
 0x115   : > { %v731_v10 = vadd.f32 %v730_v62, %v716_v37  ;;  %v1153_v13 = vadd.f32 %v1152_v0, %v1138_v63  ;;  %v938_v17 = vadd.f32 %v937_v6, %v923_v5  ;;  %v1140_v21 = vmax.f32 %v1090_v2, 0.0 }
 0x116   : > { %v1092_v19 = vpop.f32.mrf.mxu0  ;;  %v877_v3 = vpop.f32.mrf.mxu1  ;;  %v925_v25 = vmax.f32 %v875_v7, 0.0  ;;  %v1101_v31 = vadd.f32 %v1587_v8, %v2007_v55  ;;  %v886_v36 = vadd.f32 %v1569_v14, %v2007_v55 }
 0x117   : > { %v732_v20 = vadd.f32 %v731_v10, %v717_v41  ;;  %v1154_v22 = vadd.f32 %v1153_v13, %v1139_v11  ;;  %v1093_v23 = vadd.f32 %v2007_v55, %v1092_v19  ;;  %v939_v26 = vadd.f32 %v938_v17, %v924_v16 }
 0x118   : > { %v878_v27 = vadd.f32 %v2007_v55, %v877_v3  ;;  %v1590_v28 = vpop.f32.mrf.mxu0  ;;  %v1572_v33 = vpop.f32.mrf.mxu1  ;;  %v1143_v49 = vmax.f32 %v1101_v31, 0.0  ;;  %v928_v53 = vmax.f32 %v886_v36, 0.0 }
 0x119   : > { %v733_v29 = vadd.f32 %v732_v20, %v718_v9  ;;  %v1155_v30 = vadd.f32 %v1154_v22, %v1140_v21  ;;  %v1141_v32 = vmax.f32 %v1093_v23, 0.0  ;;  %v940_v35 = vadd.f32 %v939_v26, %v925_v25 }
 0x11a   : > { %v926_v37 = vmax.f32 %v878_v27, 0.0  ;;  %v1105_v38 = vpop.f32.mrf.mxu0  ;;  %v890_v42 = vpop.f32.mrf.mxu1  ;;  %v1114_v57 = vadd.f32 %v1590_v28, %v2007_v55  ;;  %v899_v62 = vadd.f32 %v1572_v33, %v2007_v55 }
 0x11b   : > { %v734_v39 = vadd.f32 %v733_v29, %v719_v15  ;;  %v1156_v41 = vadd.f32 %v1155_v30, %v1141_v32  ;;  %v1106_v43 = vadd.f32 %v2007_v55, %v1105_v38  ;;  %v891_v47 = vadd.f32 %v2007_v55, %v890_v42 }
 0x11c   : > { %v941_v46 = vadd.f32 %v940_v35, %v926_v37  ;;  %v1591_v48 = vpop.f32.mrf.mxu0  ;;  %v1573_v12 = vpop.f32.mrf.mxu1  ;;  %v1146_v14 = vmax.f32 %v1114_v57, 0.0  ;;  %v931_v18 = vmax.f32 %v899_v62, 0.0 }
 0x11d   : > { %v1157_v50 = vadd.f32 %v1156_v41, %v1142_v40  ;;  %v735_v52 = vadd.f32 %v734_v39, %v720_v44  ;;  %v1144_v58 = vmax.f32 %v1106_v43, 0.0  ;;  %v929_v63 = vmax.f32 %v891_v47, 0.0 }
 0x11e   : > { %v942_v54 = vadd.f32 %v941_v46, %v927_v45  ;;  %v1108_v56 = vpop.f32.mrf.mxu0  ;;  %v893_v60 = vpop.f32.mrf.mxu1  ;;  %v1117_v5 = vadd.f32 %v1591_v48, %v2007_v55  ;;  %v902_v10 = vadd.f32 %v1573_v12, %v2007_v55 }
 0x11f   : > { %v1158_v59 = vadd.f32 %v1157_v50, %v1143_v49  ;;  %v1109_v61 = vadd.f32 %v2007_v55, %v1108_v56  ;;  %v894_v1 = vadd.f32 %v2007_v55, %v893_v60  ;;  %v736_v8 = vadd.f32 %v735_v52, %v721_v51 }
 0x120   : > { %v943_v0 = vadd.f32 %v942_v54, %v928_v53  ;;  %v1594_v2 = vpop.f32.mrf.mxu0  ;;  %v1576_v7 = vpop.f32.mrf.mxu1  ;;  %v1147_v22 = vmax.f32 %v1117_v5, 0.0  ;;  %v932_v25 = vmax.f32 %v902_v10, 0.0 }
 0x121   : > { %v1159_v4 = vadd.f32 %v1158_v59, %v1144_v58  ;;  %v1145_v6 = vmax.f32 %v1109_v61, 0.0  ;;  %v930_v11 = vmax.f32 %v894_v1, 0.0  ;;  %v737_v24 = vrot.slane %v736_v8, 4 }
 0x122   : > { %v944_v9 = vadd.f32 %v943_v0, %v929_v63  ;;  %v1121_v13 = vpop.f32.mrf.mxu0  ;;  %v906_v16 = vpop.f32.mrf.mxu1  ;;  %v1130_v28 = vadd.f32 %v1594_v2, %v2007_v55  ;;  %v915_v33 = vadd.f32 %v1576_v7, %v2007_v55 }
 0x123   : > { %v1160_v15 = vadd.f32 %v1159_v4, %v1145_v6  ;;  %v1122_v17 = vadd.f32 %v2007_v55, %v1121_v13  ;;  %v907_v20 = vadd.f32 %v2007_v55, %v906_v16  ;;  %v738_v45 = vadd.f32 %v737_v24, %v736_v8  ;;  %v1173_v6 = vld [vmem:[#allocation2] sm:$0x7] }
 0x124   : > { %v945_v19 = vadd.f32 %v944_v9, %v930_v11  ;;  %v1595_v21 = vpop.f32.mrf.mxu0  ;;  %v1577_v23 = vpop.f32.mrf.mxu1  ;;  %v1150_v43 = vmax.f32 %v1130_v28, 0.0  ;;  %v935_v46 = vmax.f32 %v915_v33, 0.0 }
 0x125   : > { %v1161_v3 = vadd.f32 %v1160_v15, %v1146_v14  ;;  %v1148_v29 = vmax.f32 %v1122_v17, 0.0  ;;  %v933_v34 = vmax.f32 %v907_v20, 0.0  ;;  %v1133_v38 = vadd.f32 %v1595_v21, %v2007_v55 }
 0x126   : > { %v946_v26 = vadd.f32 %v945_v19, %v931_v18  ;;  %v1124_v27 = vpop.f32.mrf.mxu0  ;;  %v909_v31 = vpop.f32.mrf.mxu1  ;;  %v918_v41 = vadd.f32 %v1577_v23, %v2007_v55  ;;  %v739_v52 = vrot.slane %v738_v45, 2 }
 0x127   : > { %v1162_v30 = vadd.f32 %v1161_v3, %v1147_v22  ;;  %v1125_v32 = vadd.f32 %v2007_v55, %v1124_v27  ;;  %v910_v36 = vadd.f32 %v2007_v55, %v909_v31  ;;  %v1151_v48 = vmax.f32 %v1133_v38, 0.0 }
 0x128   : > { %v947_v35 = vadd.f32 %v946_v26, %v932_v25  ;;  %v936_v50 = vmax.f32 %v918_v41, 0.0  ;;  %v740_v58 = vadd.f32 %v739_v52, %v738_v45 }
 0x129   : > { %v1163_v37 = vadd.f32 %v1162_v30, %v1148_v29  ;;  %v1149_v39 = vmax.f32 %v1125_v32, 0.0  ;;  %v934_v42 = vmax.f32 %v910_v36, 0.0 }
 0x12a   : > { %v948_v40 = vadd.f32 %v947_v35, %v933_v34  ;;  %v741_v62 = vrot.slane %v740_v58, 1 }
 0x12b   : > { %v1164_v44 = vadd.f32 %v1163_v37, %v1149_v39 }
 0x12c   : > { %v949_v47 = vadd.f32 %v948_v40, %v934_v42  ;;  %v742_v4 = vadd.f32 %v741_v62, %v740_v58 }
 0x12d   : > { %v1165_v49 = vadd.f32 %v1164_v44, %v1150_v43 }
 0x12e   : > { %v950_v12 = vadd.f32 %v949_v47, %v935_v46 }
 0x12f   : > { %v1166_v51 = vadd.f32 %v1165_v49, %v1151_v48 }
 0x130   : > { %v951_v53 = vadd.f32 %v950_v12, %v936_v50 }
 0x131   : > { %v1167_v54 = vrot.slane %v1166_v51, 4 }
 0x132   : > { %v952_v56 = vrot.slane %v951_v53, 4 }
 0x133   : > { %v1168_v57 = vadd.f32 %v1167_v54, %v1166_v51 }
 0x134   : > { %v953_v59 = vadd.f32 %v952_v56, %v951_v53 }
 0x135   : > { %v1169_v60 = vrot.slane %v1168_v57, 2 }
 0x136   : > { %v954_v55 = vrot.slane %v953_v59, 2 }
 0x137   : > { %v1170_v61 = vadd.f32 %v1169_v60, %v1168_v57 }
 0x138   : > { %v955_v63 = vadd.f32 %v954_v55, %v953_v59 }
 0x139   : > { %v1171_v0 = vrot.slane %v1170_v61, 1 }
 0x13a   : > { %v956_v1 = vrot.slane %v955_v63, 1 }
 0x13b   : > { %v1172_v2 = vadd.f32 %v1171_v0, %v1170_v61 }
 0x13c   : > { %v957_v5 = vadd.f32 %v956_v1, %v955_v63 }
 0x13e   : > { %v1175_v7 = vsel %vm1174_vm2, %v742_v4, %v957_v5  ;;  %1182 = sbr.rel (%p1494_p12) target bundleno = 717 (0x2cd), region = 89 }
 0x13f   : > { %v1176_v8 = vsel %vm605_vm0, %v1175_v7, %v1172_v2 }
 0x140   : > { %v1177_v9 = vadd.f32 %v1176_v8, %v1173_v6 }
 0x142   : > { %1178 = vst [vmem:[#allocation2] sm:$0x7] %v1177_v9 }
 0x143   : > { %v1200_v10 = vld [vmem:[%s2142_s3 + $0x78] sm:$0xff]  ;;  %v1781_v11 = vmov 0.0   ;;  %v1199_v13 = vld [vmem:[%s2142_s3 + $0x70] sm:$0xff]  ;;  %vm1782_vm3 = vmmov 0   ;;  %v1198_v14 = vld [vmem:[%s2142_s3 + $0x68] sm:$0xff]  ;;  %v1279_v29 = vlaneseq  ;;  %vm1286_vm4 = vcmask 1042433  }
 0x144   : > { %1596 = vmatprep.subr.mxu0 %v1781_v11  ;;  %1628 = vmatprep.mubr.msk.f32.mxu0 %vm1782_vm3, %v1781_v11  ;;  %v1197_v15 = vld [vmem:[%s2142_s3 + $0x60] sm:$0xff]  ;;  %v1196_v16 = vld [vmem:[%s2142_s3 + $0x58] sm:$0xff]  ;;  %v1195_v17 = vld [vmem:[%s2142_s3 + $0x50] sm:$0xff] }
 0x145   : > { %1597 = vmatpush3.msra.mxu0 %v1200_v10  ;;  %v1194_v18 = vld [vmem:[%s2142_s3 + $0x48] sm:$0xff]  ;;  %v1193_v19 = vld [vmem:[%s2142_s3 + $0x40] sm:$0xff]  ;;  %v1192_v20 = vld [vmem:[%s2142_s3 + $0x38] sm:$0xff]  ;;  %v1280_v30 = vshrl.u32 %v1279_v29, 7 }
 0x146   : > { %1598 = vmatprep.subr.mxu0 %v1781_v11  ;;  %v1191_v21 = vld [vmem:[%s2142_s3 + $0x30] sm:$0xff]  ;;  %v1190_v22 = vld [vmem:[%s2142_s3 + $0x28] sm:$0xff]  ;;  %v1189_v3 = vld [vmem:[%s2142_s3 + $0x20] sm:$0xff] }
 0x147   : > { %1599 = vmatpush3.msra.mxu0 %v1199_v13  ;;  %v1188_v23 = vld [vmem:[%s2142_s3 + $0x18] sm:$0xff]  ;;  %v1187_v24 = vld [vmem:[%s2142_s3 + $0x10] sm:$0xff]  ;;  %v1186_v26 = vld [vmem:[%s2142_s3 + $0x8] sm:$0xff]  ;;  %v1281_v32 = vsub.s32 0, %v1280_v30 }
 0x148   : > { %1600 = vmatprep.subr.mxu0 %v1781_v11  ;;  %v1185_v27 = vld [vmem:[%s2142_s3] sm:$0xff] }
 0x149   : > { %1601 = vmatpush3.msra.mxu0 %v1198_v14  ;;  %v1183_v25 = vld [vmem:[#allocation2] sm:$0x7] }
 0x14a   : > { %1602 = vmatprep.subr.mxu0 %v1781_v11  ;;  %v1184_v28 = vmul.f32 0.00390625, %v1183_v25  ;;  %v1495_v31 = vld [vmem:[%s2143_s4] ss:$0 sm:$0xff] }
 0x14b   : > { %1603 = vmatpush3.msra.mxu0 %v1197_v15 }
 0x14c   : > { %1604 = vmatprep.subr.mxu0 %v1781_v11 }
 0x14d   : > { %1605 = vmatpush3.msra.mxu0 %v1196_v16 }
 0x14e   : > { %1606 = vmatprep.subr.mxu0 %v1781_v11 }
 0x14f   : > { %1607 = vmatpush3.msra.mxu0 %v1195_v17 }
 0x150   : > { %1608 = vmatprep.subr.mxu0 %v1781_v11 }
 0x151   : > { %1609 = vmatpush3.msra.mxu0 %v1194_v18 }
 0x152   : > { %1610 = vmatprep.subr.mxu0 %v1781_v11 }
 0x153   : > { %1611 = vmatpush3.msra.mxu0 %v1193_v19 }
 0x154   : > { %1612 = vmatprep.subr.mxu0 %v1781_v11 }
 0x155   : > { %1613 = vmatpush3.msra.mxu0 %v1192_v20 }
 0x156   : > { %1614 = vmatprep.subr.mxu0 %v1781_v11 }
 0x157   : > { %1615 = vmatpush3.msra.mxu0 %v1191_v21 }
 0x158   : > { %1616 = vmatprep.subr.mxu0 %v1781_v11 }
 0x159   : > { %1617 = vmatpush3.msra.mxu0 %v1190_v22 }
 0x15a   : > { %1618 = vmatprep.subr.mxu0 %v1781_v11 }
 0x15b   : > { %1619 = vmatpush3.msra.mxu0 %v1189_v3 }
 0x15c   : > { %1620 = vmatprep.subr.mxu0 %v1781_v11 }
 0x15d   : > { %1621 = vmatpush3.msra.mxu0 %v1188_v23 }
 0x15e   : > { %1622 = vmatprep.subr.mxu0 %v1781_v11 }
 0x15f   : > { %1623 = vmatpush3.msra.mxu0 %v1187_v24 }
 0x160   : > { %1624 = vmatprep.subr.mxu0 %v1781_v11 }
 0x161   : > { %1625 = vmatpush3.msra.mxu0 %v1186_v26 }
 0x162   : > { %1626 = vmatprep.subr.mxu0 %v1781_v11 }
 0x163   : > { %1627 = vmatpush3.msra.mxu0 %v1185_v27 }
 0x164   : > { %1629 = vmatmul.mubr.f32.vlgmr.msra.gmra.mxu0 %v1184_v28 }
 0x224   : > { %v1274_v33 = vpop.f32.mrf.mxu0 }
 0x225   : > { %v1275_v34 = vadd.f32 %v1495_v31, %v1274_v33 }
 0x226   : > { %v1630_v35 = vpop.f32.mrf.mxu0 }
 0x227   : > { %1278 = vst [vmem:[%s1938_s13] sm:$0x7] %v1275_v34  ;;  %v1282_v36 = vrot.slane %v1275_v34, %v1281_v32 }
 0x229   : > { %v1283_v37 = vsub.f32 %v1282_v36, %v1275_v34 }
 0x22b   : > { %v1284_v38 = vadd.f32 1e-06, %v1283_v37 }
 0x22d   : > { %v1285_v39 = vmul.f32 %v1284_v38, %v1284_v38 }
 0x22f   : > { %v1287_v40 = vsel %vm1286_vm4, %v1285_v39, 0.0 }
 0x230   : > { %1288 = vadd.xlane.f32.xlu0 %v1287_v40 }
 0x2b9   : > { %v1289_v41 = vpop.xlane.xlu0 %1288 }
 0x2ba   : > { %1722 = vrsqrt.f32 %v1289_v41  ;;  %vm1292_vm5 = vcmp.eq.f32.partialorder %v1289_v41, inf  ;;  %v1295_v44 = vand.u32 2147483648, %v1289_v41  ;;  %vm1294_vm6 = vcmp.eq.f32.partialorder %v1289_v41, 0.0 }
 0x2c7   : > { %v1723_v42 = vpop.eup %1722 }
 0x2c8   : > { %v1291_v43 = vmul.f32 %v1723_v42, %v1289_v41 }
 0x2ca   : > { %v1293_v45 = vsel %vm1292_vm5, %v1289_v41, %v1291_v43 }
 0x2cb   : > { %v1296_v46 = vsel %vm1294_vm6, %v1295_v44, %v1293_v45 }
 0x2cc   : > { %1297 = vst [vmem:[%s1943_s16 - $0x1] sm:$0x6] %v1296_v46 }
 0x2cd PF: > { %s17_s27 = sadd.s32 1, %s1778_s27   ;;  %s2146_s21 = smov %s1758_s22 }
 0x2ce   : > { %p14_p13 = scmp.ge.s32.totalorder %s17_s27, 6   ;;  %s2147_s22 = smov %s1869_s10 }
 0x2cf   : > { %s2148_s23 = smov %s1770_s25  ;;  %s2149_s24 = smov %s1774_s26 }
 0x2d0   : > { %s2150_s25 = smov %s2153_s28  ;;  %s2151_s26 = smov %s2157_s29 }
 0x2d1   :  { %16 = sbr.rel (!%p14_p13) target bundleno = 4 (0x4), region = 138 }

</bundles_post_ra>
